<compile_context>
chip_gen: v7x
topology: tpu7x:2x2x1
jax: 0.10.0
libtpu: 0.0.40
codegen_flags: <defaults>
</compile_context>

<pallas_src>
import jax
import jax.numpy as jnp
from jax.experimental import pallas as pl
from jax.experimental.pallas import tpu as pltpu

_LANE = 128


def _round_up(x, m):
    return ((x + m - 1) // m) * m


def _row_align(dtype):
    # Second-minor (sublane) alignment depends on dtype packing.
    return {4: 8, 2: 16, 1: 32}.get(jnp.dtype(dtype).itemsize, 8)


def _vmem_limit_bytes():
    # Per-generation scoped-VMEM limit: half of physical VMEM, capped at 64 MiB.
    # (v5e/v6e: 128 MiB physical -> 64 MiB limit; v7x: 64 MiB per-TC -> 32 MiB.)
    try:
        phys = int(pltpu.get_tpu_info().vmem_capacity_bytes)
    except Exception:
        phys = 0
    if phys <= 0:
        phys = 64 * 1024 * 1024  # conservative fallback: v7x per-TC VMEM
    return min(phys // 2, 64 * 1024 * 1024)


def fc_baseline_kernel(s_ref, c0_ref, c1_ref, c2_ref, c3_ref,
                       w_ref, b_ref, out_ref):
    """One batch tile: out = s @ w[0] + sum_i c_i @ w[1+i] + b  -> (tile, O).

    w_ref is (5, F, O) with F = G*E input lanes and O = G*4 output lanes:
      w_ref[0]     block-diagonal start-sentence weight, broadcast into all 4
                   candidate columns of each packed row group,
      w_ref[1 + i] block-diagonal candidate weight placed only in output
                   column i of each group (zeros elsewhere).
    """
    acc = jnp.dot(s_ref[...], w_ref[0], preferred_element_type=jnp.float32)
    acc = acc + jnp.dot(c0_ref[...], w_ref[1], preferred_element_type=jnp.float32)
    acc = acc + jnp.dot(c1_ref[...], w_ref[2], preferred_element_type=jnp.float32)
    acc = acc + jnp.dot(c2_ref[...], w_ref[3], preferred_element_type=jnp.float32)
    acc = acc + jnp.dot(c3_ref[...], w_ref[4], preferred_element_type=jnp.float32)
    out_ref[...] = (acc + b_ref[0]).astype(out_ref.dtype)


def fc_baseline_forward(start_sent, cand0, cand1, cand2, cand3, weight, bias,
                        *, tile_rows=None, min_grid_steps=8):
    """weight: (1, 2E) as in nn.Linear(2E, 1); bias: (1,). Returns (B, 4) f32."""
    B, E = start_sent.shape
    in_dtype = start_sent.dtype
    itemsize = jnp.dtype(in_dtype).itemsize
    row_align = _row_align(in_dtype)

    # --- lane-dense packing: fold G batch rows into one 128-lane row.  Falls
    # back to G=1 (unpacked) rather than jnp.pad-copying every input stream.
    G = _LANE // E if (E < _LANE and _LANE % E == 0) else 1
    if G > 1 and B % G != 0:
        G = 1
    F = G * E          # packed feature width (128 when packed)
    O = G * 4          # packed output width  (16 when packed)
    R = B // G         # packed batch rows == rows of the kernel's arrays

    def pack(x):
        return x.reshape(R, F) if G > 1 else x   # free row-major reshape

    s, c0, c1, c2, c3 = (pack(x) for x in (start_sent, cand0, cand1, cand2, cand3))

    # --- combined block-diagonal weight (5, F, O); zero outside the blocks.
    w = weight.astype(jnp.float32).reshape(2 * E)
    w_start, w_cand = w[:E], w[E:]
    ws4 = jnp.broadcast_to(w_start[:, None], (E, 4))                          # (E, 4)
    wc4 = w_cand[None, :, None] * jnp.eye(4, dtype=jnp.float32)[:, None, :]   # (4, E, 4)
    w_sub = jnp.concatenate([ws4[None], wc4], axis=0)                         # (5, E, 4)
    eye_g = jnp.eye(G, dtype=jnp.float32)
    w_comb = (jnp.einsum("gh,keo->kgeho", eye_g, w_sub)
              .reshape(5, F, O).astype(in_dtype))                             # (5, F, O)
    b_smem = jnp.asarray(bias, jnp.float32).reshape(1)                        # scalar bias

    # --- tile sizing with lane/sublane-padding-aware VMEM accounting.
    vmem_limit = _vmem_limit_bytes()
    budget = (vmem_limit * 3) // 4
    f_pad = _round_up(F, _LANE)
    o_pad = _round_up(O, _LANE)
    w_bytes = 2 * 5 * _round_up(F, row_align) * o_pad * itemsize  # 2 bufs (conservative)
    bytes_per_row = (5 * 2 * f_pad * itemsize     # 5 input streams, double-buffered
                     + 2 * o_pad * 4)             # f32 output, double-buffered
    if tile_rows is None:
        max_rows = max(row_align,
                       ((budget - w_bytes) // bytes_per_row) // row_align * row_align)
        # Cap so large batches give >= ~min_grid_steps steps: keeps the DMA
        # pipeline busy and lets "parallel" shard the grid over both v7x cores.
        step_cap = _round_up(pl.cdiv(R, min_grid_steps), row_align)
        tile_rows = min(max_rows, step_cap)
    if tile_rows >= R:
        tile_rows = R                 # single full-extent block (any R is legal)
    grid = (pl.cdiv(R, tile_rows),)   # last block may be partial -> Pallas masks it

    emb_spec = pl.BlockSpec((tile_rows, F), lambda i: (i, 0))
    w_spec = pl.BlockSpec((5, F, O), lambda i: (0, 0, 0))        # VMEM-resident
    b_spec = pl.BlockSpec(memory_space=pltpu.MemorySpace.SMEM)   # scalar bias in SMEM
    out_spec = pl.BlockSpec((tile_rows, O), lambda i: (i, 0))

    flops = 2 * B * (2 * E) * 4                           # useful flops only
    bytes_accessed = (5 * B * E * itemsize                # embedding streams
                      + B * 4 * 4                         # f32 output
                      + 5 * F * O * itemsize + 4)         # weights + bias

    out = pl.pallas_call(
        fc_baseline_kernel,
        out_shape=jax.ShapeDtypeStruct((R, O), jnp.float32),
        grid=grid,
        in_specs=[emb_spec] * 5 + [w_spec, b_spec],
        out_specs=out_spec,
        compiler_params=pltpu.CompilerParams(
            dimension_semantics=("parallel",),
            vmem_limit_bytes=vmem_limit),
        cost_estimate=pl.CostEstimate(
            flops=flops, transcendentals=0, bytes_accessed=bytes_accessed),
    )(s, c0, c1, c2, c3, w_comb, b_smem)

    return out.reshape(B, 4) if G > 1 else out


if __name__ == "__main__":
    emb_dim = 32
    batch = 8

    key = jax.random.PRNGKey(0)
    ks, k0, k1, k2, k3, kw, kb = jax.random.split(key, 7)

    start_sent = jax.random.normal(ks, (batch, emb_dim), dtype=jnp.float32)
    cand0 = jax.random.normal(k0, (batch, emb_dim), dtype=jnp.float32)
    cand1 = jax.random.normal(k1, (batch, emb_dim), dtype=jnp.float32)
    cand2 = jax.random.normal(k2, (batch, emb_dim), dtype=jnp.float32)
    cand3 = jax.random.normal(k3, (batch, emb_dim), dtype=jnp.float32)

    # nn.Linear(2E, 1) init range: U(-1/sqrt(2E), 1/sqrt(2E)) (deterministic here).
    bound = 1.0 / jnp.sqrt(2.0 * emb_dim)
    weight = jax.random.uniform(kw, (1, 2 * emb_dim), minval=-bound, maxval=bound,
                                dtype=jnp.float32)
    bias = jax.random.uniform(kb, (1,), minval=-bound, maxval=bound, dtype=jnp.float32)

    out = fc_baseline_forward(start_sent, cand0, cand1, cand2, cand3, weight, bias)
    out = jax.block_until_ready(out)

    # Pure-JAX reference of the PyTorch forward.
    def ref_score(c):
        return jnp.concatenate([start_sent, c], axis=1) @ weight.T + bias
    ref = jnp.concatenate([ref_score(cand0), ref_score(cand1),
                           ref_score(cand2), ref_score(cand3)], axis=1)

    assert out.shape == (batch, 4)
    assert jnp.allclose(out, ref, atol=1e-5, rtol=1e-5)

    # TODO(synk): self.loss (CrossEntropyLoss) is defined but unused in forward(); not implemented.
    print("KERNEL_OK")
</pallas_src>

<mosaic_0001>
module attributes {stable_mosaic.version = 11 : i64} {
  func.func @fc_baseline_kernel(%arg0: i32, %arg1: memref<2x128xf32, #tpu.memory_space<vmem>>, %arg2: memref<2x128xf32, #tpu.memory_space<vmem>>, %arg3: memref<2x128xf32, #tpu.memory_space<vmem>>, %arg4: memref<2x128xf32, #tpu.memory_space<vmem>>, %arg5: memref<2x128xf32, #tpu.memory_space<vmem>>, %arg6: memref<5x128x16xf32, #tpu.memory_space<vmem>>, %arg7: memref<1xf32, #tpu.memory_space<smem>>, %arg8: memref<2x16xf32, #tpu.memory_space<vmem>>) attributes {dimension_semantics = [#tpu.dimension_semantics<parallel>], iteration_bounds = array<i64: 1>, scalar_prefetch = 0 : i64, scratch_operands = 0 : i64, tpu.core_type = #tpu.core_type<tc>, window_params = [{transform_indices = @transform_0, window_bounds = array<i64: 2, 128>}, {transform_indices = @transform_1, window_bounds = array<i64: 2, 128>}, {transform_indices = @transform_2, window_bounds = array<i64: 2, 128>}, {transform_indices = @transform_3, window_bounds = array<i64: 2, 128>}, {transform_indices = @transform_4, window_bounds = array<i64: 2, 128>}, {pipeline_mode = #tpu.pipeline_mode<synchronous>, transform_indices = @transform_5, window_bounds = array<i64: 5, 128, 16>}, {transform_indices = @transform_6, window_bounds = array<i64: 1>}, {transform_indices = @transform_7, window_bounds = array<i64: 2, 16>}]} {
    %c0 = arith.constant 0 : index
    %c0_0 = arith.constant 0 : index
    %0 = vector.load %arg1[%c0, %c0_0] : memref<2x128xf32, #tpu.memory_space<vmem>>, vector<2x128xf32>
    %c0_1 = arith.constant 0 : index
    %c0_2 = arith.constant 0 : index
    %c0_3 = arith.constant 0 : index
    %1 = vector.load %arg6[%c0_1, %c0_2, %c0_3] : memref<5x128x16xf32, #tpu.memory_space<vmem>>, vector<1x128x16xf32>
    %2 = vector.shape_cast %1 : vector<1x128x16xf32> to vector<128x16xf32>
    %cst = arith.constant dense<0.000000e+00> : vector<2x16xf32>
    %3 = tpu.matmul %0, %2, %cst {dimension_numbers = #tpu.dot_dimension_numbers<[1], [0], [0], [1], [0, 0, 1, 1], [], []>} : vector<2x128xf32>, vector<128x16xf32>, vector<2x16xf32> -> vector<2x16xf32>
    %c0_4 = arith.constant 0 : index
    %c0_5 = arith.constant 0 : index
    %4 = vector.load %arg2[%c0_4, %c0_5] : memref<2x128xf32, #tpu.memory_space<vmem>>, vector<2x128xf32>
    %c1 = arith.constant 1 : index
    %c0_6 = arith.constant 0 : index
    %c0_7 = arith.constant 0 : index
    %5 = vector.load %arg6[%c1, %c0_6, %c0_7] : memref<5x128x16xf32, #tpu.memory_space<vmem>>, vector<1x128x16xf32>
    %6 = vector.shape_cast %5 : vector<1x128x16xf32> to vector<128x16xf32>
    %cst_8 = arith.constant dense<0.000000e+00> : vector<2x16xf32>
    %7 = tpu.matmul %4, %6, %cst_8 {dimension_numbers = #tpu.dot_dimension_numbers<[1], [0], [0], [1], [0, 0, 1, 1], [], []>} : vector<2x128xf32>, vector<128x16xf32>, vector<2x16xf32> -> vector<2x16xf32>
    %8 = arith.addf %3, %7 : vector<2x16xf32>
    %c0_9 = arith.constant 0 : index
    %c0_10 = arith.constant 0 : index
    %9 = vector.load %arg3[%c0_9, %c0_10] : memref<2x128xf32, #tpu.memory_space<vmem>>, vector<2x128xf32>
    %c2 = arith.constant 2 : index
    %c0_11 = arith.constant 0 : index
    %c0_12 = arith.constant 0 : index
    %10 = vector.load %arg6[%c2, %c0_11, %c0_12] : memref<5x128x16xf32, #tpu.memory_space<vmem>>, vector<1x128x16xf32>
    %11 = vector.shape_cast %10 : vector<1x128x16xf32> to vector<128x16xf32>
    %cst_13 = arith.constant dense<0.000000e+00> : vector<2x16xf32>
    %12 = tpu.matmul %9, %11, %cst_13 {dimension_numbers = #tpu.dot_dimension_numbers<[1], [0], [0], [1], [0, 0, 1, 1], [], []>} : vector<2x128xf32>, vector<128x16xf32>, vector<2x16xf32> -> vector<2x16xf32>
    %13 = arith.addf %8, %12 : vector<2x16xf32>
    %c0_14 = arith.constant 0 : index
    %c0_15 = arith.constant 0 : index
    %14 = vector.load %arg4[%c0_14, %c0_15] : memref<2x128xf32, #tpu.memory_space<vmem>>, vector<2x128xf32>
    %c3 = arith.constant 3 : index
    %c0_16 = arith.constant 0 : index
    %c0_17 = arith.constant 0 : index
    %15 = vector.load %arg6[%c3, %c0_16, %c0_17] : memref<5x128x16xf32, #tpu.memory_space<vmem>>, vector<1x128x16xf32>
    %16 = vector.shape_cast %15 : vector<1x128x16xf32> to vector<128x16xf32>
    %cst_18 = arith.constant dense<0.000000e+00> : vector<2x16xf32>
    %17 = tpu.matmul %14, %16, %cst_18 {dimension_numbers = #tpu.dot_dimension_numbers<[1], [0], [0], [1], [0, 0, 1, 1], [], []>} : vector<2x128xf32>, vector<128x16xf32>, vector<2x16xf32> -> vector<2x16xf32>
    %18 = arith.addf %13, %17 : vector<2x16xf32>
    %c0_19 = arith.constant 0 : index
    %c0_20 = arith.constant 0 : index
    %19 = vector.load %arg5[%c0_19, %c0_20] : memref<2x128xf32, #tpu.memory_space<vmem>>, vector<2x128xf32>
    %c4 = arith.constant 4 : index
    %c0_21 = arith.constant 0 : index
    %c0_22 = arith.constant 0 : index
    %20 = vector.load %arg6[%c4, %c0_21, %c0_22] : memref<5x128x16xf32, #tpu.memory_space<vmem>>, vector<1x128x16xf32>
    %21 = vector.shape_cast %20 : vector<1x128x16xf32> to vector<128x16xf32>
    %cst_23 = arith.constant dense<0.000000e+00> : vector<2x16xf32>
    %22 = tpu.matmul %19, %21, %cst_23 {dimension_numbers = #tpu.dot_dimension_numbers<[1], [0], [0], [1], [0, 0, 1, 1], [], []>} : vector<2x128xf32>, vector<128x16xf32>, vector<2x16xf32> -> vector<2x16xf32>
    %23 = arith.addf %18, %22 : vector<2x16xf32>
    %c0_24 = arith.constant 0 : index
    %24 = memref.load %arg7[%c0_24] : memref<1xf32, #tpu.memory_space<smem>>
    %25 = vector.broadcast %24 : f32 to vector<2x16xf32>
    %26 = arith.addf %23, %25 : vector<2x16xf32>
    %c0_25 = arith.constant 0 : index
    %c0_26 = arith.constant 0 : index
    %27 = vector.load %arg8[%c0_25, %c0_26] : memref<2x16xf32, #tpu.memory_space<vmem>>, vector<2x16xf32>
    tpu.vector_store %arg8[%c0_25, %c0_26], %26 {strides = array<i32>} : memref<2x16xf32, #tpu.memory_space<vmem>>, vector<2x16xf32>,
    return
  }
  func.func @transform_0(%arg0: i32) -> (i32, i32) {
    %c0_i32 = arith.constant 0 : i32
    %c0_i32_0 = arith.constant 0 : i32
    return %arg0, %c0_i32 : i32, i32
  }
  func.func @transform_1(%arg0: i32) -> (i32, i32) {
    %c0_i32 = arith.constant 0 : i32
    %c0_i32_0 = arith.constant 0 : i32
    return %arg0, %c0_i32 : i32, i32
  }
  func.func @transform_2(%arg0: i32) -> (i32, i32) {
    %c0_i32 = arith.constant 0 : i32
    %c0_i32_0 = arith.constant 0 : i32
    return %arg0, %c0_i32 : i32, i32
  }
  func.func @transform_3(%arg0: i32) -> (i32, i32) {
    %c0_i32 = arith.constant 0 : i32
    %c0_i32_0 = arith.constant 0 : i32
    return %arg0, %c0_i32 : i32, i32
  }
  func.func @transform_4(%arg0: i32) -> (i32, i32) {
    %c0_i32 = arith.constant 0 : i32
    %c0_i32_0 = arith.constant 0 : i32
    return %arg0, %c0_i32 : i32, i32
  }
  func.func @transform_5(%arg0: i32) -> (i32, i32, i32) {
    %c0_i32 = arith.constant 0 : i32
    %c0_i32_0 = arith.constant 0 : i32
    %c0_i32_1 = arith.constant 0 : i32
    %c0_i32_2 = arith.constant 0 : i32
    return %c0_i32, %c0_i32_0, %c0_i32_1 : i32, i32, i32
  }
  func.func @transform_6(%arg0: i32) -> i32 {
    %c0_i32 = arith.constant 0 : i32
    %c0_i32_0 = arith.constant 0 : i32
    return %c0_i32 : i32
  }
  func.func @transform_7(%arg0: i32) -> (i32, i32) {
    %c0_i32 = arith.constant 0 : i32
    %c0_i32_0 = arith.constant 0 : i32
    return %arg0, %c0_i32 : i32, i32
  }
}

</mosaic_0001>

<bundles_post_ra>
// kernel: tpu_custom_call.1
= control target key start
LH: loop header
LB: loop body
LE: loop exit
PB: predicated region body
PF: predicated region fallthrough
CT: control target
= control target key end

     0   :  { %v961_v3 = vmov 0.0|0.0   ;;  %vm962_vm0 = vmmov 0   ;;  %v963_v11 = vmov 0.0   ;;  %s1325_s0 = inlined_call_operand.vmem [shape: f32[2,128], index: 0, kind: input, shape index: {}]   ;;  %s1326_s1 = inlined_call_operand.vmem [shape: f32[2,128], index: 1, kind: input, shape index: {}]   ;;  %s1327_s2 = inlined_call_operand.vmem [shape: f32[2,128], index: 2, kind: input, shape index: {}]   ;;  %s1328_s3 = inlined_call_operand.vmem [shape: f32[2,128], index: 3, kind: input, shape index: {}]   ;;  %s1329_s4 = inlined_call_operand.vmem [shape: f32[2,128], index: 4, kind: input, shape index: {}]   ;;  %s1330_s5 = inlined_call_operand.vmem [shape: f32[5,128,16], index: 5, kind: input, shape index: {}]   ;;  %s1331_s6 = inlined_call_operand.<no memory space> [shape: f32[1], index: 6, kind: input, shape index: {}]   ;;  %s1332_s7 = inlined_call_operand.hbm [shape: f32[2,16], index: 7, kind: output, shape index: {}]  }
   0x1   :  { %v489_v0 = vld [vmem:[%s1330_s5 + $0x80] sm:$0xff]  ;;  %v490_v1 = vld [vmem:[%s1330_s5 + $0x88] sm:$0xff]  ;;  %813 = vmatprep.subr.bf16.mxu0 %v961_v3  ;;  %837 = vmatprep.subr.bf16.mxu1 %v961_v3  ;;  %v491_v6 = vld [vmem:[%s1330_s5 + $0x90] sm:$0xff] }
   0x2   :  { %v29_v2 = vld [vmem:[%s1330_s5] sm:$0xff]  ;;  %v814_v4 = vpack.c.bf16 %v490_v1, %v489_v0  ;;  %v30_v5 = vld [vmem:[%s1330_s5 + $0x8] sm:$0xff]  ;;  %v492_v7 = vld [vmem:[%s1330_s5 + $0x98] sm:$0xff]  ;;  %670 = vmatprep.mubr.msk.f32.mxu0 %vm962_vm0, %v963_v11  ;;  %705 = vmatprep.mubr.msk.f32.mxu1 %vm962_vm0, %v963_v11 }
   0x3   :  { %v838_v8 = vpack.c.bf16 %v30_v5, %v29_v2  ;;  %v31_v9 = vld [vmem:[%s1330_s5 + $0x10] sm:$0xff]  ;;  %v32_v10 = vld [vmem:[%s1330_s5 + $0x18] sm:$0xff]  ;;  %v817_v12 = vpack.c.bf16 %v492_v7, %v491_v6  ;;  %v493_v14 = vld [vmem:[%s1330_s5 + $0xa0] sm:$0xff] }
   0x4   :  { %815 = vmatpush3.bf16.msra.mxu0 %v814_v4  ;;  %v841_v13 = vpack.c.bf16 %v32_v10, %v31_v9  ;;  %v494_v15 = vld [vmem:[%s1330_s5 + $0xa8] sm:$0xff]  ;;  %v33_v16 = vld [vmem:[%s1330_s5 + $0x20] sm:$0xff]  ;;  %v495_v20 = vld [vmem:[%s1330_s5 + $0xb0] sm:$0xff] }
   0x5   :  { %839 = vmatpush3.bf16.msra.mxu1 %v838_v8  ;;  %816 = vmatprep.subr.bf16.mxu0 %v961_v3  ;;  %v34_v17 = vld [vmem:[%s1330_s5 + $0x28] sm:$0xff]  ;;  %v820_v18 = vpack.c.bf16 %v494_v15, %v493_v14  ;;  %v496_v21 = vld [vmem:[%s1330_s5 + $0xb8] sm:$0xff]  ;;  %v35_v22 = vld [vmem:[%s1330_s5 + $0x30] sm:$0xff] }
   0x6   :  { %840 = vmatprep.subr.bf16.mxu1 %v961_v3  ;;  %v844_v19 = vpack.c.bf16 %v34_v17, %v33_v16  ;;  %v36_v23 = vld [vmem:[%s1330_s5 + $0x38] sm:$0xff]  ;;  %v823_v24 = vpack.c.bf16 %v496_v21, %v495_v20  ;;  %v497_v26 = vld [vmem:[%s1330_s5 + $0xc0] sm:$0xff]  ;;  %v498_v27 = vld [vmem:[%s1330_s5 + $0xc8] sm:$0xff] }
   0x7   :  { %v847_v25 = vpack.c.bf16 %v36_v23, %v35_v22  ;;  %v37_v28 = vld [vmem:[%s1330_s5 + $0x40] sm:$0xff]  ;;  %v38_v29 = vld [vmem:[%s1330_s5 + $0x48] sm:$0xff]  ;;  %v826_v30 = vpack.c.bf16 %v498_v27, %v497_v26  ;;  %v499_v32 = vld [vmem:[%s1330_s5 + $0xd0] sm:$0xff] }
   0x8   :  { %818 = vmatpush3.bf16.msra.mxu0 %v817_v12  ;;  %v850_v31 = vpack.c.bf16 %v38_v29, %v37_v28  ;;  %v500_v33 = vld [vmem:[%s1330_s5 + $0xd8] sm:$0xff]  ;;  %v39_v34 = vld [vmem:[%s1330_s5 + $0x50] sm:$0xff]  ;;  %v501_v38 = vld [vmem:[%s1330_s5 + $0xe0] sm:$0xff] }
   0x9   :  { %842 = vmatpush3.bf16.msra.mxu1 %v841_v13  ;;  %819 = vmatprep.subr.bf16.mxu0 %v961_v3  ;;  %v40_v35 = vld [vmem:[%s1330_s5 + $0x58] sm:$0xff]  ;;  %v829_v36 = vpack.c.bf16 %v500_v33, %v499_v32  ;;  %v502_v39 = vld [vmem:[%s1330_s5 + $0xe8] sm:$0xff]  ;;  %v41_v40 = vld [vmem:[%s1330_s5 + $0x60] sm:$0xff] }
   0xa   :  { %843 = vmatprep.subr.bf16.mxu1 %v961_v3  ;;  %v853_v37 = vpack.c.bf16 %v40_v35, %v39_v34  ;;  %v42_v41 = vld [vmem:[%s1330_s5 + $0x68] sm:$0xff]  ;;  %v832_v42 = vpack.c.bf16 %v502_v39, %v501_v38  ;;  %v503_v44 = vld [vmem:[%s1330_s5 + $0xf0] sm:$0xff]  ;;  %v504_v45 = vld [vmem:[%s1330_s5 + $0xf8] sm:$0xff] }
   0xb   :  { %v856_v43 = vpack.c.bf16 %v42_v41, %v41_v40  ;;  %v43_v46 = vld [vmem:[%s1330_s5 + $0x70] sm:$0xff]  ;;  %v44_v47 = vld [vmem:[%s1330_s5 + $0x78] sm:$0xff]  ;;  %v835_v48 = vpack.c.bf16 %v504_v45, %v503_v44  ;;  %v505_v50 = vld [vmem:[%s1330_s5 + $0x100] sm:$0xff] }
   0xc   :  { %821 = vmatpush3.bf16.msra.mxu0 %v820_v18  ;;  %v859_v49 = vpack.c.bf16 %v44_v47, %v43_v46  ;;  %v506_v51 = vld [vmem:[%s1330_s5 + $0x108] sm:$0xff] }
   0xd   :  { %845 = vmatpush3.bf16.msra.mxu1 %v844_v19  ;;  %822 = vmatprep.subr.bf16.mxu0 %v961_v3 }
   0xe   :  { %846 = vmatprep.subr.bf16.mxu1 %v961_v3 }
  0x10   :  { %824 = vmatpush3.bf16.msra.mxu0 %v823_v24 }
  0x11   :  { %848 = vmatpush3.bf16.msra.mxu1 %v847_v25  ;;  %825 = vmatprep.subr.bf16.mxu0 %v961_v3 }
  0x12   :  { %849 = vmatprep.subr.bf16.mxu1 %v961_v3 }
  0x14   :  { %827 = vmatpush3.bf16.msra.mxu0 %v826_v30 }
  0x15   :  { %851 = vmatpush3.bf16.msra.mxu1 %v850_v31  ;;  %828 = vmatprep.subr.bf16.mxu0 %v961_v3 }
  0x16   :  { %852 = vmatprep.subr.bf16.mxu1 %v961_v3 }
  0x18   :  { %830 = vmatpush3.bf16.msra.mxu0 %v829_v36 }
  0x19   :  { %854 = vmatpush3.bf16.msra.mxu1 %v853_v37  ;;  %831 = vmatprep.subr.bf16.mxu0 %v961_v3 }
  0x1a   :  { %855 = vmatprep.subr.bf16.mxu1 %v961_v3 }
  0x1c   :  { %833 = vmatpush3.bf16.msra.mxu0 %v832_v42 }
  0x1d   :  { %857 = vmatpush3.bf16.msra.mxu1 %v856_v43  ;;  %834 = vmatprep.subr.bf16.mxu0 %v961_v3 }
  0x1e   :  { %13 = vsyncpa [#allocation4], 0  ;;  %858 = vmatprep.subr.bf16.mxu1 %v961_v3  ;;  %v521_v52 = vld [vmem:[%s1330_s5 + $0x180] sm:$0xff]  ;;  %v522_v53 = vld [vmem:[%s1330_s5 + $0x188] sm:$0xff]  ;;  %v862_v55 = vpack.c.bf16 %v506_v51, %v505_v50  ;;  %vm473_vm1 = vcmask 123904  }
  0x1f   :  { %v45_v54 = vld [vmem:[%s1326_s1] sm:$0x3]  ;;  %v886_v57 = vpack.c.bf16 %v522_v53, %v521_v52  ;;  %v507_v58 = vld [vmem:[%s1330_s5 + $0x110] sm:$0xff]  ;;  %v508_v59 = vld [vmem:[%s1330_s5 + $0x118] sm:$0xff] }
  0x20   :  { %836 = vmatpush3.bf16.msra.mxu0 %v835_v48  ;;  %v28_v56 = vld [vmem:[%s1325_s0] sm:$0x3]  ;;  %v523_v60 = vld [vmem:[%s1330_s5 + $0x190] sm:$0xff]  ;;  %v524_v61 = vld [vmem:[%s1330_s5 + $0x198] sm:$0xff]  ;;  %v865_v62 = vpack.c.bf16 %v508_v59, %v507_v58 }
  0x21   :  { %860 = vmatpush3.bf16.msra.mxu1 %v859_v49  ;;  %861 = vmatprep.subr.bf16.mxu0 %v961_v3  ;;  %v889_v63 = vpack.c.bf16 %v524_v61, %v523_v60  ;;  %v509_v0 = vld [vmem:[%s1330_s5 + $0x120] sm:$0xff]  ;;  %v510_v1 = vld [vmem:[%s1330_s5 + $0x128] sm:$0xff]  ;;  %v511_v7 = vld [vmem:[%s1330_s5 + $0x130] sm:$0xff] }
  0x22   :  { %885 = vmatprep.subr.bf16.mxu1 %v961_v3  ;;  %v525_v2 = vld [vmem:[%s1330_s5 + $0x1a0] sm:$0xff]  ;;  %v526_v4 = vld [vmem:[%s1330_s5 + $0x1a8] sm:$0xff]  ;;  %v868_v5 = vpack.c.bf16 %v510_v1, %v509_v0  ;;  %v512_v8 = vld [vmem:[%s1330_s5 + $0x138] sm:$0xff] }
  0x23   :  { %671 = vmatmul.mubr.f32.vlgmr.msra.gmra.mrb[0].mxu0 %v45_v54  ;;  %v892_v6 = vpack.c.bf16 %v526_v4, %v525_v2  ;;  %v527_v9 = vld [vmem:[%s1330_s5 + $0x1b0] sm:$0xff]  ;;  %v528_v10 = vld [vmem:[%s1330_s5 + $0x1b8] sm:$0xff]  ;;  %v871_v12 = vpack.c.bf16 %v512_v8, %v511_v7  ;;  %v513_v14 = vld [vmem:[%s1330_s5 + $0x140] sm:$0xff] }
  0x24   :  { %706 = vmatmul.mubr.f32.vlgmr.msra.gmra.mrb[0].mxu1 %v28_v56  ;;  %863 = vmatpush3.bf16.msra.mxu0 %v862_v55  ;;  %v895_v13 = vpack.c.bf16 %v528_v10, %v527_v9  ;;  %v514_v15 = vld [vmem:[%s1330_s5 + $0x148] sm:$0xff]  ;;  %v529_v16 = vld [vmem:[%s1330_s5 + $0x1c0] sm:$0xff]  ;;  %v515_v20 = vld [vmem:[%s1330_s5 + $0x150] sm:$0xff] }
  0x25   :  { %887 = vmatpush3.bf16.msra.mxu1 %v886_v57  ;;  %864 = vmatprep.subr.bf16.mxu0 %v961_v3  ;;  %v530_v17 = vld [vmem:[%s1330_s5 + $0x1c8] sm:$0xff]  ;;  %v874_v18 = vpack.c.bf16 %v514_v15, %v513_v14  ;;  %v516_v21 = vld [vmem:[%s1330_s5 + $0x158] sm:$0xff]  ;;  %v531_v22 = vld [vmem:[%s1330_s5 + $0x1d0] sm:$0xff] }
  0x26   :  { %888 = vmatprep.subr.bf16.mxu1 %v961_v3  ;;  %740 = vmatprep.mubr.msk.f32.mxu0 %vm962_vm0, %v963_v11  ;;  %v898_v19 = vpack.c.bf16 %v530_v17, %v529_v16  ;;  %v532_v23 = vld [vmem:[%s1330_s5 + $0x1d8] sm:$0xff]  ;;  %v877_v24 = vpack.c.bf16 %v516_v21, %v515_v20  ;;  %v517_v26 = vld [vmem:[%s1330_s5 + $0x160] sm:$0xff]  ;;  %v518_v27 = vld [vmem:[%s1330_s5 + $0x168] sm:$0xff] }
  0x27   :  { %775 = vmatprep.mubr.msk.f32.mxu1 %vm962_vm0, %v963_v11  ;;  %v901_v25 = vpack.c.bf16 %v532_v23, %v531_v22  ;;  %v533_v28 = vld [vmem:[%s1330_s5 + $0x1e0] sm:$0xff]  ;;  %v534_v29 = vld [vmem:[%s1330_s5 + $0x1e8] sm:$0xff]  ;;  %v880_v30 = vpack.c.bf16 %v518_v27, %v517_v26  ;;  %v519_v32 = vld [vmem:[%s1330_s5 + $0x170] sm:$0xff] }
  0x28   :  { %866 = vmatpush3.bf16.msra.mxu0 %v865_v62  ;;  %v904_v31 = vpack.c.bf16 %v534_v29, %v533_v28  ;;  %v520_v33 = vld [vmem:[%s1330_s5 + $0x178] sm:$0xff]  ;;  %v535_v34 = vld [vmem:[%s1330_s5 + $0x1f0] sm:$0xff]  ;;  %v537_v38 = vld [vmem:[%s1330_s5 + $0x200] sm:$0xff] }
  0x29   :  { %890 = vmatpush3.bf16.msra.mxu1 %v889_v63  ;;  %867 = vmatprep.subr.bf16.mxu0 %v961_v3  ;;  %v536_v35 = vld [vmem:[%s1330_s5 + $0x1f8] sm:$0xff]  ;;  %v883_v36 = vpack.c.bf16 %v520_v33, %v519_v32  ;;  %v538_v39 = vld [vmem:[%s1330_s5 + $0x208] sm:$0xff]  ;;  %v203_v40 = vld [vmem:[%s1327_s2] sm:$0x3]  ;;  %s964_s2 = smov [#allocation3]  }
  0x2a   :  { %891 = vmatprep.subr.bf16.mxu1 %v961_v3  ;;  %v907_v37 = vpack.c.bf16 %v536_v35, %v535_v34  ;;  %v910_v41 = vpack.c.bf16 %v538_v39, %v537_v38  ;;  %v292_v42 = vld [vmem:[%s1328_s3] sm:$0x3]  ;;  %v539_v43 = vld [vmem:[%s1330_s5 + $0x210] sm:$0xff]  ;;  %v540_v44 = vld [vmem:[%s1330_s5 + $0x218] sm:$0xff]  ;;  %s481_s24 = sshll.u32 %s964_s2, 4  ;;  %s482_s24 = int_to_ptr.vmem [resolvable:$true] %s481_s24 }
  0x2b   :  { %v913_v45 = vpack.c.bf16 %v540_v44, %v539_v43  ;;  %v541_v46 = vld [vmem:[%s1330_s5 + $0x220] sm:$0xff]  ;;  %v542_v47 = vld [vmem:[%s1330_s5 + $0x228] sm:$0xff]  ;;  %v543_v49 = vld [vmem:[%s1330_s5 + $0x230] sm:$0xff]  ;;  %p942_p1 = scmp.lt.s32.totalorder %s482_s24, %s482_s24 }
  0x2c   :  { %869 = vmatpush3.bf16.msra.mxu0 %v868_v5  ;;  %v916_v48 = vpack.c.bf16 %v542_v47, %v541_v46  ;;  %v544_v50 = vld [vmem:[%s1330_s5 + $0x238] sm:$0xff]  ;;  %v546_v52 = vld [vmem:[%s1330_s5 + $0x248] sm:$0xff]  ;;  %v547_v54 = vld [vmem:[%s1330_s5 + $0x250] sm:$0xff] }
  0x2d   :  { %893 = vmatpush3.bf16.msra.mxu1 %v892_v6  ;;  %870 = vmatprep.subr.bf16.mxu0 %v961_v3  ;;  %v919_v51 = vpack.c.bf16 %v544_v50, %v543_v49  ;;  %v548_v55 = vld [vmem:[%s1330_s5 + $0x258] sm:$0xff]  ;;  %v549_v57 = vld [vmem:[%s1330_s5 + $0x260] sm:$0xff]  ;;  %v550_v58 = vld [vmem:[%s1330_s5 + $0x268] sm:$0xff] }
  0x2e   :  { %894 = vmatprep.subr.bf16.mxu1 %v961_v3  ;;  %v925_v56 = vpack.c.bf16 %v548_v55, %v547_v54  ;;  %v928_v59 = vpack.c.bf16 %v550_v58, %v549_v57  ;;  %v551_v60 = vld [vmem:[%s1330_s5 + $0x270] sm:$0xff]  ;;  %v552_v61 = vld [vmem:[%s1330_s5 + $0x278] sm:$0xff]  ;;  %v381_v63 = vld [vmem:[%s1329_s4] sm:$0x3]  ;;  %s937_s4 = scalar_lea.vmem %s482_s24, 32 }
  0x2f   :  { %v931_v62 = vpack.c.bf16 %v552_v61, %v551_v60  ;;  %p938_p0 = scmp.ne.s32.totalorder %s482_s24, %s937_s4  ;;  %p943_p2 = scmp.lt.s32.totalorder %s937_s4, %s937_s4 }
  0x30   :  { %872 = vmatpush3.bf16.msra.mxu0 %v871_v12 }
  0x31   :  { %896 = vmatpush3.bf16.msra.mxu1 %v895_v13  ;;  %873 = vmatprep.subr.bf16.mxu0 %v961_v3  ;;  %p944_p3 = por %p943_p2, %p942_p1 }
  0x32   :  { %897 = vmatprep.subr.bf16.mxu1 %v961_v3 }
  0x33   :  { %p945_p4 = pnand %p944_p3, %p938_p0 }
  0x34   :  { %875 = vmatpush3.bf16.msra.mxu0 %v874_v18 }
  0x35   :  { %899 = vmatpush3.bf16.msra.mxu1 %v898_v19  ;;  %876 = vmatprep.subr.bf16.mxu0 %v961_v3 }
  0x36   :  { %900 = vmatprep.subr.bf16.mxu1 %v961_v3 }
  0x38   :  { %878 = vmatpush3.bf16.msra.mxu0 %v877_v24 }
  0x39   :  { %902 = vmatpush3.bf16.msra.mxu1 %v901_v25  ;;  %879 = vmatprep.subr.bf16.mxu0 %v961_v3 }
  0x3a   :  { %903 = vmatprep.subr.bf16.mxu1 %v961_v3 }
  0x3c   :  { %881 = vmatpush3.bf16.msra.mxu0 %v880_v30 }
  0x3d   :  { %905 = vmatpush3.bf16.msra.mxu1 %v904_v31  ;;  %882 = vmatprep.subr.bf16.mxu0 %v961_v3 }
  0x3e   :  { %906 = vmatprep.subr.bf16.mxu1 %v961_v3 }
  0x40   :  { %884 = vmatpush3.bf16.msra.mxu0 %v883_v36 }
  0x41   :  { %908 = vmatpush3.bf16.msra.mxu1 %v907_v37  ;;  %909 = vmatprep.subr.bf16.mxu0 %v961_v3 }
  0x43   :  { %741 = vmatmul.mubr.f32.vlgmr.msra.gmra.mrb[2].mxu0 %v203_v40 }
  0x44   :  { %911 = vmatpush3.bf16.msra.mxu0 %v910_v41  ;;  %776 = vmatmul.mubr.f32.vlgmr.msra.gmra.mrb[2].mxu1 %v292_v42 }
  0x45   :  { %912 = vmatprep.subr.bf16.mxu0 %v961_v3  ;;  %810 = vmatprep.mubr.msk.f32.mxu0 %vm962_vm0, %v963_v11  ;;  %v545_v11 = vld [vmem:[%s1330_s5 + $0x240] sm:$0xff] }
  0x46   :  { %v922_v53 = vpack.c.bf16 %v546_v52, %v545_v11 }
  0x48   :  { %914 = vmatpush3.bf16.msra.mxu0 %v913_v45 }
  0x49   :  { %915 = vmatprep.subr.bf16.mxu0 %v961_v3 }
  0x4c   :  { %917 = vmatpush3.bf16.msra.mxu0 %v916_v48 }
  0x4d   :  { %918 = vmatprep.subr.bf16.mxu0 %v961_v3 }
  0x50   :  { %920 = vmatpush3.bf16.msra.mxu0 %v919_v51 }
  0x51   :  { %921 = vmatprep.subr.bf16.mxu0 %v961_v3 }
  0x54   :  { %923 = vmatpush3.bf16.msra.mxu0 %v922_v53 }
  0x55   :  { %924 = vmatprep.subr.bf16.mxu0 %v961_v3 }
  0x58   :  { %926 = vmatpush3.bf16.msra.mxu0 %v925_v56 }
  0x59   :  { %927 = vmatprep.subr.bf16.mxu0 %v961_v3 }
  0x5c   :  { %929 = vmatpush3.bf16.msra.mxu0 %v928_v59 }
  0x5d   :  { %930 = vmatprep.subr.bf16.mxu0 %v961_v3  ;;  %v471_v3 = vstv %s1331_s6 }
  0x60   :  { %932 = vmatpush3.bf16.msra.mxu0 %v931_v62 }
  0x63   :  { %811 = vmatmul.mubr.f32.vlgmr.msra.gmra.mrb[4].mxu0 %v381_v63 }
  0xf6   :  { %v129_v0 = vpop.f32.mrb[0].mxu0 }
  0xf7   :  { %v672_v1 = vpop.f32.mrb[1].mxu0  ;;  %v199_v2 = vpop.f32.mrb[0].mxu1 }
  0xf8   :  { %v200_v4 = vadd.f32 %v199_v2, %v129_v0  ;;  %v707_v5 = vpop.f32.mrb[1].mxu1 }
 0x116   :  { %v287_v6 = vpop.f32.mrb[2].mxu0 }
 0x117   :  { %v291_v7 = vadd.f32 %v287_v6, %v200_v4  ;;  %v742_v8 = vpop.f32.mrb[3].mxu0  ;;  %v376_v9 = vpop.f32.mrb[2].mxu1 }
 0x118   :  { %v777_v10 = vpop.f32.mrb[3].mxu1 }
 0x119   :  { %v380_v12 = vadd.f32 %v376_v9, %v291_v7 }
 0x136   :  { %v465_v13 = vpop.f32.mrb[4].mxu0 }
 0x137   :  { %v469_v14 = vadd.f32 %v465_v13, %v380_v12  ;;  %v812_v15 = vpop.f32.mrb[5].mxu0 }
 0x139   :  { %v472_v16 = vadd.f32 %v471_v3, %v469_v14 }
 0x13b   :  { %474 = vst.msk [vmem:[#allocation3] sm:$0x3] %vm473_vm1, %v472_v16 }
 0x13c   :  { %948 = shalt.err (!%p945_p4)
}
 0x13d   :  { %s949_s26 = scalar_lea.hbm %s1332_s7, 32 }
 0x13e   :  { %p950_p5 = scmp.ne.s32.totalorder %s1332_s7, %s949_s26  ;;  %p953_p6 = scmp.lt.u32.totalorder %s949_s26, %s1332_s7 }
 0x140   :  { %p955_p7 = pnand %p953_p6, %p950_p5 }
 0x142   :  { %958 = shalt.err (!%p955_p7)
}
 0x143   :  { %484 = dma.vmem_to_hbm [thread:$0]  %s482_s24, 32, %s1332_s7, [#allocation4]  }
 0x144   :  { %959 = dma.done.wait [#allocation4], 32  }
 0x145   :  { %960 = vsyncadd [#allocation4], 4294967264 }
 0x146   :  { %488 = vsyncpa [#allocation4], 1 }

</bundles_post_ra>
